<compile_context>
chip_gen: v5e
topology: v5e:2x2
jax: 0.10.0
libtpu: 0.0.40
codegen_flags: <defaults>
</compile_context>

<pallas_src>
import functools

import jax
import jax.numpy as jnp
from jax import lax
from jax.experimental import pallas as pl
from jax.experimental.pallas import tpu as pltpu


# Finite "-inf": exp underflows to exactly 0 for masked tokens.
# NOTE(semantics): for a row with *no* valid tokens PyTorch produces NaN
# (softmax over all -inf); this finite bias yields a uniform token average
# instead.  Identical results whenever at least one token is valid.
_MASK_BIAS = -1e30


# ----------------------------------------------------------------------------
# Fused kernel: one (batch item, label tile) per grid step.
# ----------------------------------------------------------------------------
def _ml_attention_kernel(w_ref, tok_ref, bias_ref, out_ref, *,
                         label_axis, slice_weight, label_tile):
    # w_ref    : (L_pad, H) bf16 resident weight  OR  (TL, H) bf16 weight tile
    # tok_ref  : (1, S, H)  bf16 token embeddings of the current batch item
    # bias_ref : (1, 1, S)  f32 additive mask bias (0 valid / -1e30 masked)
    # out_ref  : (1, TL, H) per-label sentence embeddings
    if slice_weight:
        lt = pl.program_id(label_axis)
        off = pl.multiple_of(lt * label_tile, label_tile)
        w = w_ref[pl.ds(off, label_tile), :]                  # (TL, H) bf16
    else:
        w = w_ref[...]                                        # (TL, H) bf16
    tok = tok_ref[0]                                          # (S, H)  bf16
    bias = bias_ref[0]                                        # (1, S)  f32

    # scores[l, s] = sum_h w[l, h] * tok[s, h]   (bf16 MXU, f32 accumulate)
    scores = lax.dot_general(
        w, tok, (((1,), (1,)), ((), ())),
        preferred_element_type=jnp.float32)                   # (TL, S)
    scores = scores + bias                                    # additive mask

    # numerically-stable softmax numerator / denominator over the lane axis
    m = jnp.max(scores, axis=-1, keepdims=True)               # (TL, 1)
    e = jnp.exp(scores - m)                                   # (TL, S) f32
    denom = jnp.sum(e, axis=-1, keepdims=True)                # (TL, 1)

    # Un-normalized weighted token sum on the MXU (bf16 in, f32 acc), then
    # scale by the EUP approximate reciprocal of the softmax denominator.
    acc = jnp.dot(e.astype(jnp.bfloat16), tok,
                  preferred_element_type=jnp.float32)         # (TL, H)
    out = acc * pl.reciprocal(denom, approx=True)
    out_ref[0] = out.astype(out_ref.dtype)


# ----------------------------------------------------------------------------
# Module forward (wrapper)
# ----------------------------------------------------------------------------
def ml_attention_for_sbert(features, attn_weight, *, label_tile=None,
                           weight_resident_bytes=4 * 1024 * 1024,
                           vmem_limit_bytes=32 * 1024 * 1024):
    """features: dict with 'token_embeddings' (B,S,H) and 'attention_mask' (B,S).
    attn_weight: (L, H) weight of the bias-free Linear (rows = labels)."""
    tok = features["token_embeddings"]
    mask = features["attention_mask"]
    B, S, H = tok.shape
    L, H_w = attn_weight.shape
    assert H_w == H, "weight hidden size mismatch"

    # ---- label tiling (pad L up to a sublane-aligned multiple of the tile) --
    if label_tile is None:
        label_tile = min(256, L)
    label_tile = max(8, ((label_tile + 7) // 8) * 8)
    n_lt = pl.cdiv(L, label_tile)
    L_pad = n_lt * label_tile

    # ---- operands: bf16 matmul inputs + additive f32 mask bias --------------
    w_bf16 = attn_weight.astype(jnp.bfloat16)
    if L_pad != L:
        w_bf16 = jnp.pad(w_bf16, ((0, L_pad - L), (0, 0)))
    tok_bf16 = tok.astype(jnp.bfloat16)
    bias = jnp.where(mask.astype(bool), 0.0, _MASK_BIAS)
    bias = bias.astype(jnp.float32).reshape(B, 1, S)

    # ---- grid order & weight residency --------------------------------------
    weight_resident = (L_pad * H * 2) <= weight_resident_bytes
    if weight_resident:
        # Whole weight DMA'd once (constant block index => stays in VMEM);
        # the token block index depends only on b, so tokens are also resident
        # across the inner label-tile axis.  HBM traffic = L*H + B*S*H.
        grid = (B, n_lt)
        label_axis = 1
        slice_weight = n_lt > 1
        w_spec = pl.BlockSpec((L_pad, H), lambda b, lt: (0, 0))
        tok_map = lambda b, lt: (b, 0, 0)
        out_map = lambda b, lt: (b, lt, 0)
    else:
        slice_weight = False
        if S >= label_tile:
            # tokens are the larger operand: keep them resident across lt.
            grid = (B, n_lt)
            label_axis = 1
            w_spec = pl.BlockSpec((label_tile, H), lambda b, lt: (lt, 0))
            tok_map = lambda b, lt: (b, 0, 0)
            out_map = lambda b, lt: (b, lt, 0)
        else:
            # weight tiles are the larger operand: keep them resident across b.
            grid = (n_lt, B)
            label_axis = 0
            w_spec = pl.BlockSpec((label_tile, H), lambda lt, b: (lt, 0))
            tok_map = lambda lt, b: (b, 0, 0)
            out_map = lambda lt, b: (b, lt, 0)

    kernel = functools.partial(
        _ml_attention_kernel,
        label_axis=label_axis, slice_weight=slice_weight, label_tile=label_tile)

    out = pl.pallas_call(
        kernel,
        out_shape=jax.ShapeDtypeStruct((B, L_pad, H), tok.dtype),
        grid=grid,
        in_specs=[
            w_spec,                                  # label weight
            pl.BlockSpec((1, S, H), tok_map),        # token embeddings
            pl.BlockSpec((1, 1, S), tok_map),        # additive mask bias
        ],
        out_specs=pl.BlockSpec((1, label_tile, H), out_map),
        compiler_params=pltpu.CompilerParams(
            dimension_semantics=("parallel", "parallel"),
            vmem_limit_bytes=vmem_limit_bytes),
    )(w_bf16, tok_bf16, bias)

    if L_pad != L:
        out = out[:, :L, :]

    new_features = dict(features)
    # PyTorch does `.squeeze()`: drops any size-1 dims (no-op for B>1, L>1).
    new_features["sentence_embedding"] = jnp.squeeze(out)
    return new_features


if __name__ == "__main__":
    # small shapes: batch=2, seq=16, hidden=128, num_embeddings(labels)=64
    B, S, H, L = 2, 16, 128, 64

    key = jax.random.PRNGKey(0)
    k_w, k_tok = jax.random.split(key)

    # Inputs snapped to the bf16 grid so the bf16 MXU path stays close to the
    # f32 HIGHEST-precision reference.
    W = (jax.random.normal(k_w, (L, H), jnp.float32) * 0.125)
    W = W.astype(jnp.bfloat16).astype(jnp.float32)
    tok = jax.random.normal(k_tok, (B, S, H), jnp.float32)
    tok = tok.astype(jnp.bfloat16).astype(jnp.float32)

    # first row fully valid, second row half padded
    lengths = jnp.array([S, S // 2], dtype=jnp.int32)
    mask = jnp.arange(S)[None, :] < lengths[:, None]          # (B, S) bool

    features = {"token_embeddings": tok, "attention_mask": mask}

    # reference (plain JAX, PyTorch semantics)
    scores = jnp.einsum("bsh,lh->bls", tok, W, precision=lax.Precision.HIGHEST)
    scores = jnp.where(mask[:, None, :], scores, -jnp.inf)
    attn = jax.nn.softmax(scores, axis=-1)
    ref = jnp.einsum("bls,bsh->blh", attn, tok, precision=lax.Precision.HIGHEST)
    ref = jnp.squeeze(ref)

    # Exercise all code paths:
    #  (1) default: single resident weight block, no in-kernel slicing
    #  (2) resident weight + dynamic in-kernel label-tile slicing
    #  (3) streamed weight tiles with swapped grid order (label_tile > S)
    configs = [
        dict(),
        dict(label_tile=16),
        dict(label_tile=32, weight_resident_bytes=0),
    ]
    for cfg in configs:
        out_features = ml_attention_for_sbert(features, W, **cfg)
        sent = out_features["sentence_embedding"]
        jax.block_until_ready(sent)
        assert sent.shape == ref.shape == (B, L, H), (sent.shape, cfg)
        # bf16 matmul inputs + approx reciprocal => bf16-level tolerance
        assert jnp.allclose(sent, ref, rtol=2e-2, atol=2e-2), cfg

    print("KERNEL_OK")
</pallas_src>

<mosaic_0001>
module attributes {stable_mosaic.version = 11 : i64} {
  func.func @_ml_attention_kernel(%arg0: i32, %arg1: i32, %arg2: memref<64x128xbf16, #tpu.memory_space<vmem>>, %arg3: memref<1x16x128xbf16, #tpu.memory_space<vmem>>, %arg4: memref<1x1x16xf32, #tpu.memory_space<vmem>>, %arg5: memref<1x64x128xf32, #tpu.memory_space<vmem>>) attributes {dimension_semantics = [#tpu.dimension_semantics<parallel>, #tpu.dimension_semantics<parallel>], iteration_bounds = array<i64: 2, 1>, scalar_prefetch = 0 : i64, scratch_operands = 0 : i64, tpu.core_type = #tpu.core_type<tc>, window_params = [{pipeline_mode = #tpu.pipeline_mode<synchronous>, transform_indices = @transform_0, window_bounds = array<i64: 64, 128>}, {transform_indices = @transform_1, window_bounds = array<i64: 1, 16, 128>}, {transform_indices = @transform_2, window_bounds = array<i64: 1, 1, 16>}, {transform_indices = @transform_3, window_bounds = array<i64: 1, 64, 128>}]} {
    %c0 = arith.constant 0 : index
    %c0_0 = arith.constant 0 : index
    %0 = vector.load %arg2[%c0, %c0_0] : memref<64x128xbf16, #tpu.memory_space<vmem>>, vector<64x128xbf16>
    %c0_1 = arith.constant 0 : index
    %c0_2 = arith.constant 0 : index
    %c0_3 = arith.constant 0 : index
    %1 = vector.load %arg3[%c0_1, %c0_2, %c0_3] : memref<1x16x128xbf16, #tpu.memory_space<vmem>>, vector<1x16x128xbf16>
    %2 = vector.shape_cast %1 : vector<1x16x128xbf16> to vector<16x128xbf16>
    %c0_4 = arith.constant 0 : index
    %c0_5 = arith.constant 0 : index
    %c0_6 = arith.constant 0 : index
    %3 = vector.load %arg4[%c0_4, %c0_5, %c0_6] : memref<1x1x16xf32, #tpu.memory_space<vmem>>, vector<1x1x16xf32>
    %4 = vector.shape_cast %3 : vector<1x1x16xf32> to vector<1x16xf32>
    %cst = arith.constant dense<0.000000e+00> : vector<64x16xf32>
    %5 = tpu.matmul %0, %2, %cst {dimension_numbers = #tpu.dot_dimension_numbers<[1], [1], [0], [0], [0, 0, 1, 0], [], []>} : vector<64x128xbf16>, vector<16x128xbf16>, vector<64x16xf32> -> vector<64x16xf32>
    %6 = vector.broadcast %4 : vector<1x16xf32> to vector<64x16xf32>
    %7 = arith.addf %5, %6 : vector<64x16xf32>
    %cst_7 = arith.constant dense<0xFF800000> : vector<64xf32>
    %8 = vector.multi_reduction <maximumf>, %7, %cst_7 [1] : vector<64x16xf32> to vector<64xf32>
    %9 = vector.shape_cast %8 : vector<64xf32> to vector<64x1xf32>
    %10 = vector.broadcast %9 : vector<64x1xf32> to vector<64x16xf32>
    %11 = arith.subf %7, %10 : vector<64x16xf32>
    %12 = math.exp %11 : vector<64x16xf32>
    %cst_8 = arith.constant dense<0.000000e+00> : vector<64xf32>
    %13 = vector.multi_reduction <add>, %12, %cst_8 [1] : vector<64x16xf32> to vector<64xf32>
    %14 = vector.shape_cast %13 : vector<64xf32> to vector<64x1xf32>
    %15 = arith.truncf %12 : vector<64x16xf32> to vector<64x16xbf16>
    %cst_9 = arith.constant dense<0.000000e+00> : vector<64x128xf32>
    %16 = tpu.matmul %15, %2, %cst_9 {dimension_numbers = #tpu.dot_dimension_numbers<[1], [0], [0], [1], [0, 0, 1, 1], [], []>} : vector<64x16xbf16>, vector<16x128xbf16>, vector<64x128xf32> -> vector<64x128xf32>
    %17 = tpu.reciprocal %14 {approx = true} : vector<64x1xf32> -> vector<64x1xf32>
    %18 = vector.broadcast %17 : vector<64x1xf32> to vector<64x128xf32>
    %19 = arith.mulf %16, %18 : vector<64x128xf32>
    %c0_10 = arith.constant 0 : index
    %c0_11 = arith.constant 0 : index
    %c0_12 = arith.constant 0 : index
    %20 = vector.load %arg5[%c0_10, %c0_11, %c0_12] : memref<1x64x128xf32, #tpu.memory_space<vmem>>, vector<1x64x128xf32>
    %21 = vector.shape_cast %20 : vector<1x64x128xf32> to vector<64x128xf32>
    %22 = vector.shape_cast %19 : vector<64x128xf32> to vector<1x64x128xf32>
    tpu.vector_store %arg5[%c0_10, %c0_11, %c0_12], %22 {strides = array<i32>} : memref<1x64x128xf32, #tpu.memory_space<vmem>>, vector<1x64x128xf32>,
    return
  }
  func.func @transform_0(%arg0: i32, %arg1: i32) -> (i32, i32) {
    %c0_i32 = arith.constant 0 : i32
    %c0_i32_0 = arith.constant 0 : i32
    %c0_i32_1 = arith.constant 0 : i32
    return %c0_i32, %c0_i32_0 : i32, i32
  }
  func.func @transform_1(%arg0: i32, %arg1: i32) -> (i32, i32, i32) {
    %c0_i32 = arith.constant 0 : i32
    %c0_i32_0 = arith.constant 0 : i32
    %c0_i32_1 = arith.constant 0 : i32
    return %arg0, %c0_i32, %c0_i32_0 : i32, i32, i32
  }
  func.func @transform_2(%arg0: i32, %arg1: i32) -> (i32, i32, i32) {
    %c0_i32 = arith.constant 0 : i32
    %c0_i32_0 = arith.constant 0 : i32
    %c0_i32_1 = arith.constant 0 : i32
    return %arg0, %c0_i32, %c0_i32_0 : i32, i32, i32
  }
  func.func @transform_3(%arg0: i32, %arg1: i32) -> (i32, i32, i32) {
    %c0_i32 = arith.constant 0 : i32
    %c0_i32_0 = arith.constant 0 : i32
    return %arg0, %arg1, %c0_i32 : i32, i32, i32
  }
}

</mosaic_0001>

<bundles_post_ra>
// kernel: tpu_custom_call.1
= control target key start
LH: loop header
LB: loop body
LE: loop exit
PB: predicated region body
PF: predicated region fallthrough
CT: control target
= control target key end

     0   :  { %8 = vsyncpa [#allocation3], 0  ;;  %s1182_s0 = inlined_call_operand.hbm [shape: bf16[64,128], index: 0, kind: input, shape index: {}]   ;;  %s1183_s1 = inlined_call_operand.hbm [shape: bf16[2,16,128], index: 1, kind: input, shape index: {}]   ;;  %s1184_s2 = inlined_call_operand.hbm [shape: f32[2,1,16], index: 2, kind: input, shape index: {}]   ;;  %s1185_s3 = inlined_call_operand.hbm [shape: f32[2,64,128], index: 3, kind: output, shape index: {}]  }
   0x1   :  { %9 = vsyncpa [#allocation6], 0 }
   0x2   :  { %11 = vsyncpa [#allocation6 + $0x1], 0 }
   0x3   :  { %12 = vsyncpa [#allocation4], 0 }
   0x4   :  { %14 = vsyncpa [#allocation4 + $0x1], 0  ;;  %s969_s12 = smov 0   ;;  %s971_s13 = smov 0  }
   0x5   :  { %s973_s14 = smov 0   ;;  %s975_s15 = smov 0  }
   0x6   :  { %s977_s16 = smov 0   ;;  %s979_s17 = smov 0  }
   0x7 LB: > { %s32_s18 = sadd.s32 1, %s938_s16  ;;  %s60_s19 = sadd.s32 1, %s930_s14  ;;  %s942_s17 = sphi %s979_s17, %s20_s17   ;;  %s938_s16 = sphi %s977_s16, %s1196_s16   ;;  %s934_s15 = sphi %s975_s15, %s1195_s15   ;;  %s930_s14 = sphi %s973_s14, %s1194_s14   ;;  %s926_s13 = sphi %s971_s13, %s1193_s13   ;;  %s922_s12 = sphi %s969_s12, %s1192_s12  }
   0x8   : > { %p34_p0 = scmp.ge.s32.totalorder %s32_s18, 2  ;;  %p67_p1 = scmp.ne.s32.totalorder %s930_s14, %s926_s13 }
   0x9   : > { %p68_p2 = scmp.eq.s32.totalorder %s942_s17, 0  ;;  %p605_p4 = scmp.ge.s32.totalorder %s942_s17, 2 }
   0xa   : > { %s1198_s18 = smov (%p34_p0, %s32_s18), 0  ;;  %p677_p6 = scmp.lt.s32.totalorder %s942_s17, 2 }
   0xb   : > { %p1009_p3 = por %p68_p2, %p67_p1  ;;  %s57_s21 = ssub.s32 %s938_s16, %s1198_s18 }
   0xc   : > { %p58_p5 = scmp.eq.s32.totalorder %s57_s21, 0  ;;  %s165_s22 = sand.u32 1, %s942_s17  }
   0xd   : > { %s167_s23 = sand.u32 1, %s930_s14   ;;  %s642_s26 = sshll.u32 %s938_s16, 3 }
   0xe   : > { %s1020_s24 = scalar_select %p58_p5, %s930_s14, %s60_s19  }
   0xf   : > { %s606_s25 = sshll.u32 %s167_s23, 3  ;;  %s174_s29 = scalar_lea.hbm %s1183_s1, %s642_s26 }
  0x10   : > { %s169_s30 = scalar_lea.vmem [#allocation5], %s606_s25  ;;  %s175_s5 = sshll.u32 %s174_s29, 4  ;;  %s176_s5 = int_to_ptr.hbm [resolvable:$true] %s175_s5 }
  0x11   : > { %s177_s4 = sshll.u32 %s169_s30, 4  ;;  %p1030_p7 = pnand %p677_p6, %p1009_p3  ;;  %s178_s4 = int_to_ptr.vmem [resolvable:$true] %s177_s4 }
  0x12   : > { %s1034_s7 = scalar_lea.sflag [#allocation6], %s165_s22  ;;  %s944_s8 = smov 64  }
  0x13   : > { %s945_s9 = smov 4   ;;  %s1043_s10 = sadd.s32 4294967295, %s942_s17  }
  0x14   : > { %668 = dma.hbm_to_vmem [thread:$0]  (!%p1030_p7), %s176_s5, 128, %s178_s4, %s1034_s7, %s944_s8, %s944_s8, %s945_s9  }
  0x15   : > { %s602_s11 = sadd.s32 4294967294, %s942_s17   ;;  %p73_p8 = scmp.ne.s32.totalorder %s926_s13, %s922_s12 }
  0x16   : > { %p74_p9 = scmp.eq.s32.totalorder %s1043_s10, 0  ;;  %p125_p10 = scmp.eq.s32.totalorder %s1043_s10, 1 }
  0x17   : > { %p131_p11 = scmp.eq.s32.totalorder %s602_s11, 1  ;;  %p603_p12 = scmp.ge.s32.totalorder %s942_s17, 1 }
  0x18   : > { %p1053_p13 = por %p74_p9, %p73_p8  ;;  %p1060_p0 = por %p125_p10, %p67_p1 }
  0x19   : > { %p1064_p2 = por %p131_p11, %p73_p8  ;;  %p138_p3 = scmp.lt.s32.totalorder %s942_s17, 3 }
  0x1a   : > { %s149_s26 = sshll.u32 %s1182_s0, 4  ;;  %s946_s28 = smov [#allocation2]   ;;  %s150_s26 = int_to_ptr.hbm [resolvable:$true] %s149_s26 }
  0x1b   : > { %p1072_p5 = pnand %p603_p12, %p138_p3  ;;  %s151_s29 = sshll.u32 %s946_s28, 4  ;;  %s152_s29 = int_to_ptr.vmem [resolvable:$true] %s151_s29 }
  0x1c   : > { %s193_s5 = scalar_lea.hbm %s1184_s2, %s938_s16  ;;  %s190_s22 = scalar_lea.vmem [#allocation7], %s167_s23 }
  0x1d   : > { %p661_p1 = pneg %p1072_p5  ;;  %s195_s11 = sshll.u32 %s193_s5, 4  ;;  %s196_s11 = int_to_ptr.hbm [resolvable:$true] %s195_s11 }
  0x1e   : > { %s197_s25 = sshll.u32 %s190_s22, 4  ;;  %206 = sbr.rel (%p1072_p5) target bundleno = 508 (0x1fc), region = 32  ;;  %s198_s25 = int_to_ptr.vmem [resolvable:$true] %s197_s25 }
  0x1f   : > { %p662_p6 = pnand %p661_p1, %p74_p9 }
  0x20   : > { %671 = dma.hbm_to_vmem [thread:$0]  (!%p1030_p7), %s196_s11, 16, %s198_s25, %s1034_s7  }
  0x21   : > { %664 = dma.hbm_to_vmem [thread:$0]  (!%p662_p6), %s150_s26, 512, %s152_s29, [#allocation3], %s944_s8, %s944_s8, %s945_s9  }
  0x23   : > { %909 = dma.done.wait (%p74_p9), [#allocation3], 512  }
  0x24   : > { %911 = vsyncadd (%p74_p9), [#allocation3], 4294966784  ;;  %s213_s23 = sand.u32 1, %s1043_s10   ;;  %s1100_s28 = sand.u32 1, %s926_s13  }
  0x25   : > { %s611_s30 = sshll.u32 %s1100_s28, 3  ;;  %s214_s8 = scalar_lea.sflag [#allocation6], %s213_s23 }
  0x26   : > { %s217_s6 = scalar_lea.vmem [#allocation5], %s611_s30 }
  0x27   : > { %913 = dma.done.wait (%p1053_p13), %s214_s8, 144  }
  0x28   : > { %915 = vsyncadd (%p1053_p13), %s214_s8, 4294967152  ;;  %v647_v0 = vld [vmem:[%s217_s6] sm:$0xff]  ;;  %s226_s7 = scalar_lea.vmem [#allocation7], %s1100_s28  ;;  %v645_v2 = vld [vmem:[#allocation2 + $0x10] sm:$0xff]  ;;  %vm329_vm0 = vcmask 130048   ;;  %s612_s9 = sshll.u32 %s1100_s28, 6 }
  0x29   : > { %307 = vmatpush.bf16.xpose.msra.mxu0 %v647_v0  ;;  %649 = vmatpush.bf16.xpose.msra.mxu2 %v647_v0  ;;  %v643_v1 = vld [vmem:[#allocation2] sm:$0xff]  ;;  %v644_v3 = vld [vmem:[#allocation2 + $0x8] sm:$0xff]  ;;  %v646_v4 = vld [vmem:[#allocation2 + $0x18] sm:$0xff]  ;;  %s1133_s10 = scalar_lea.vmem [#allocation8], %s612_s9  ;;  %s648_s19 = sshll.u32 %s934_s15, 6 }
  0x2a   : > { %650 = vmatpush.bf16.msra.mxu3 %v647_v0  ;;  %425 = vmatpush.bf16.msra.mxu1 %v647_v0  ;;  %v733_v6 = vld [vmem:[%s226_s7] ss:$0 sm:$0xff]  ;;  %s485_s29 = scalar_lea.hbm %s1185_s3, %s648_s19  ;;  %s486_s4 = sshll.u32 %s1133_s10, 4  ;;  %s487_s4 = int_to_ptr.vmem [resolvable:$true] %s486_s4 }
  0x2b   : > { %s488_s5 = sshll.u32 %s485_s29, 4  ;;  %s472_s11 = scalar_lea.sflag [#allocation4], %s1100_s28  ;;  %s489_s5 = int_to_ptr.hbm [resolvable:$true] %s488_s5 }
  0x2c   : > { %s870_s15 = sshra.s32 %s489_s5, 4  ;;  %s876_s30 = scalar_lea.hbm %s1185_s3, 128  ;;  %s871_s15 = int_to_ptr.hbm [resolvable:$true] %s870_s15 }
  0x2d   : > { %s872_s22 = scalar_lea.hbm %s871_s15, 64  ;;  %p877_p10 = scmp.lt.s32.totalorder %s871_s15, %s1185_s3 }
  0x2e   : > { %p873_p7 = scmp.ne.s32.totalorder %s871_s15, %s872_s22  ;;  %p878_p11 = scmp.lt.s32.totalorder %s876_s30, %s872_s22 }
  0x30   : > { %308 = vmatmul.bf16.vlgmr.msra.gmra.mxu0 %v643_v1  ;;  %318 = vmatmul.bf16.vlgmr.msra.gmra.mxu2 %v645_v2  ;;  %p874_p8 = pnand %p873_p7, %p1060_p0  ;;  %p879_p12 = por %p878_p11, %p877_p10 }
  0x32   : > { %p875_p9 = pneg %p874_p8 }
  0x34   : > { %p880_p13 = pnand %p879_p12, %p875_p9 }
  0x40   : > { %313 = vmatmul.bf16.gmra.mxu0 %v644_v3  ;;  %323 = vmatmul.bf16.gmra.mxu2 %v646_v4 }
  0xad   : > { %v309_v5 = vpop.f32.mrf.mxu0 }
  0xae   : > { %v310_v26 = vadd.f32 %v733_v6, %v309_v5 }
  0xb0   : > { %v330_v29 = vsel %vm329_vm0, %v310_v26, -inf }
  0xb3   : > { %v319_v7 = vpop.f32.mrf.mxu2 }
  0xb4   : > { %v320_v8 = vadd.f32 %v733_v6, %v319_v7 }
  0xb5   : > { %v311_v9 = vpop.f32.mrf.mxu0 }
  0xb6   : > { %v342_v10 = vsel %vm329_vm0, %v320_v8, -inf  ;;  %v312_v17 = vadd.f32 %v733_v6, %v311_v9 }
  0xb7   : > { %343 = vmax.xlane.f32.xlu1 %v342_v10 }
  0xb8   : > { %v333_v23 = vsel %vm329_vm0, %v312_v17, -inf }
  0xbb   : > { %v321_v11 = vpop.f32.mrf.mxu2 }
  0xbc   : > { %v322_v12 = vadd.f32 %v733_v6, %v321_v11 }
  0xbd   : > { %v314_v13 = vpop.f32.mrf.mxu0 }
  0xbe   : > { %v315_v14 = vadd.f32 %v733_v6, %v314_v13  ;;  %v345_v15 = vsel %vm329_vm0, %v322_v12, -inf }
  0xbf   : > { %346 = vmax.xlane.f32.xlu1 %v345_v15 }
  0xc0   : > { %v336_v16 = vsel %vm329_vm0, %v315_v14, -inf }
  0xc1   : > { %337 = vmax.xlane.f32.xlu0 %v336_v16 }
  0xc3   : > { %v324_v18 = vpop.f32.mrf.mxu2 }
  0xc4   : > { %v1111_v19 = vadd.f32 %v733_v6, %v324_v18 }
  0xc5   : > { %v316_v20 = vpop.f32.mrf.mxu0 }
  0xc6   : > { %v317_v21 = vadd.f32 %v733_v6, %v316_v20  ;;  %v348_v22 = vsel %vm329_vm0, %v1111_v19, -inf }
  0xc7   : > { %349 = vmax.xlane.f32.xlu2 %v348_v22  ;;  %334 = vmax.xlane.f32.xlu1 %v333_v23 }
  0xc8   : > { %v339_v24 = vsel %vm329_vm0, %v317_v21, -inf }
  0xc9   : > { %340 = vmax.xlane.f32.xlu0 %v339_v24 }
  0xcb   : > { %v326_v25 = vpop.f32.mrf.mxu2 }
  0xcc   : > { %v327_v27 = vadd.f32 %v733_v6, %v326_v25 }
  0xce   : > { %v351_v28 = vsel %vm329_vm0, %v327_v27, -inf }
  0xcf   : > { %352 = vmax.xlane.f32.xlu2 %v351_v28 }
  0xd1   : > { %331 = vmax.xlane.f32.xlu0 %v330_v29 }
 0x12a   : > { %v344_v30 = vpop.xlane.xlu1 %343 }
 0x12b   : > { %v358_v31 = vsub.f32 %v320_v8, %v344_v30 }
 0x12d   : > { %v370_v32 = vmul.f32 1.442695, %v358_v31 }
 0x12f   : > { %734 = vpow2.f32 %v370_v32 }
 0x132   : > { %v347_v33 = vpop.xlane.xlu1 %346 }
 0x133   : > { %v359_v38 = vsub.f32 %v322_v12, %v347_v33 }
 0x134   : > { %v338_v34 = vpop.xlane.xlu0 %337 }
 0x135   : > { %v735_v35 = vpop.eup %734  ;;  %v356_v36 = vsub.f32 %v315_v14, %v338_v34  ;;  %v372_v42 = vmul.f32 1.442695, %v359_v38 }
 0x136   : > { %v390_v37 = vsel %vm329_vm0, %v735_v35, 0.0 }
 0x137   : > { %v366_v39 = vmul.f32 1.442695, %v356_v36  ;;  %391 = vadd.xlane.f32.xlu0 %v390_v37 }
 0x139   : > { %736 = vpow2.f32 %v366_v39 }
 0x13a   : > { %v350_v40 = vpop.xlane.xlu2 %349  ;;  %v335_v41 = vpop.xlane.xlu1 %334  ;;  %738 = vpow2.f32 %v372_v42 }
 0x13b   : > { %v355_v43 = vsub.f32 %v312_v17, %v335_v41  ;;  %v360_v1 = vsub.f32 %v1111_v19, %v350_v40 }
 0x13c   : > { %v341_v44 = vpop.xlane.xlu0 %340 }
 0x13d   : > { %v364_v45 = vmul.f32 1.442695, %v355_v43  ;;  %v357_v46 = vsub.f32 %v317_v21, %v341_v44  ;;  %v374_v4 = vmul.f32 1.442695, %v360_v1 }
 0x13f   : > { %v737_v47 = vpop.eup %736  ;;  %v368_v48 = vmul.f32 1.442695, %v357_v46  ;;  %740 = vpow2.f32 %v364_v45 }
 0x140   : > { %v384_v49 = vsel %vm329_vm0, %v737_v47, 0.0  ;;  %v739_v53 = vpop.eup %738 }
 0x141   : > { %742 = vpow2.f32 %v368_v48  ;;  %385 = vadd.xlane.f32.xlu1 %v384_v49  ;;  %v393_v60 = vsel %vm329_vm0, %v739_v53, 0.0  ;;  %v404_v6 = vpack.c.bf16 %v739_v53, %v735_v35 }
 0x142   : > { %v353_v50 = vpop.xlane.xlu2 %352 }
 0x143   : > { %v361_v51 = vsub.f32 %v327_v27, %v353_v50 }
 0x144   : > { %v332_v52 = vpop.xlane.xlu0 %331 }
 0x145   : > { %v376_v54 = vmul.f32 1.442695, %v361_v51  ;;  %v354_v55 = vsub.f32 %v310_v26, %v332_v52  ;;  %v741_v56 = vpop.eup %740 }
 0x146   : > { %v381_v59 = vsel %vm329_vm0, %v741_v56, 0.0 }
 0x147   : > { %v743_v57 = vpop.eup %742  ;;  %744 = vpow2.f32 %v376_v54  ;;  %v362_v58 = vmul.f32 1.442695, %v354_v55  ;;  %382 = vadd.xlane.f32.xlu0 %v381_v59 }
 0x148   : > { %v403_v61 = vpack.c.bf16 %v743_v57, %v737_v47  ;;  %v387_v5 = vsel %vm329_vm0, %v743_v57, 0.0 }
 0x149   : > { %746 = vpow2.f32 %v362_v58  ;;  %394 = vadd.xlane.f32.xlu1 %v393_v60 }
 0x14a   : > { %634 = vmatmul.msk.bf16.vlgmr.msra.gmra.mxu3 %vm329_vm0, %v403_v61  ;;  %748 = vpow2.f32 %v374_v4 }
 0x14d   : > { %v745_v62 = vpop.eup %744 }
 0x14e   : > { %v399_v63 = vsel %vm329_vm0, %v745_v62, 0.0 }
 0x14f   : > { %v747_v0 = vpop.eup %746  ;;  %400 = vadd.xlane.f32.xlu0 %v399_v63 }
 0x150   : > { %v378_v2 = vsel %vm329_vm0, %v747_v0, 0.0  ;;  %v402_v3 = vpack.c.bf16 %v741_v56, %v747_v0  ;;  %v749_v7 = vpop.eup %748 }
 0x151   : > { %379 = vadd.xlane.f32.xlu2 %v378_v2  ;;  %v396_v8 = vsel %vm329_vm0, %v749_v7, 0.0  ;;  %v405_v9 = vpack.c.bf16 %v745_v62, %v749_v7 }
 0x152   : > { %633 = vmatmul.msk.bf16.vlgmr.msra.gmra.mxu1 %vm329_vm0, %v402_v3 }
 0x159   : > { %388 = vadd.xlane.f32.xlu2 %v387_v5 }
 0x15a   : > { %635 = vmatmul.msk.bf16.gmra.mxu3 %vm329_vm0, %v404_v6 }
 0x161   : > { %397 = vadd.xlane.f32.xlu2 %v396_v8 }
 0x16a   : > { %636 = vmatmul.msk.bf16.gmra.mxu3 %vm329_vm0, %v405_v9 }
 0x1aa   : > { %v392_v12 = vpop.xlane.xlu0 %391 }
 0x1b4   : > { %v386_v10 = vpop.xlane.xlu1 %385 }
 0x1b5   : > { %750 = vrcp.f32 %v386_v10 }
 0x1ba   : > { %v383_v16 = vpop.xlane.xlu0 %382 }
 0x1bb   : > { %v751_v14 = vpop.eup %750 }
 0x1bc   : > { %v395_v27 = vpop.xlane.xlu1 %394 }
 0x1c2   : > { %v401_v35 = vpop.xlane.xlu0 %400 }
 0x1c4   : > { %v380_v11 = vpop.xlane.xlu2 %379 }
 0x1c5   : > { %752 = vrcp.f32 %v380_v11 }
 0x1cb   : > { %v753_v18 = vpop.eup %752 }
 0x1cc   : > { %v389_v13 = vpop.xlane.xlu2 %388 }
 0x1cd   : > { %v432_v15 = vpop.f32.mrf.mxu3  ;;  %754 = vrcp.f32 %v389_v13 }
 0x1ce   : > { %v457_v17 = vmul.f32 %v751_v14, %v432_v15  ;;  %756 = vrcp.f32 %v383_v16 }
 0x1cf   : > { %v427_v19 = vpop.f32.mrf.mxu1  ;;  %758 = vrcp.f32 %v392_v12 }
 0x1d0   : > { %465 = vst [vmem:[%s1133_s10 + $0x10] sm:$0xff] %v457_v17  ;;  %v455_v20 = vmul.f32 %v753_v18, %v427_v19  ;;  %760 = vrcp.f32 %v395_v27 }
 0x1d2   : > { %463 = vst [vmem:[%s1133_s10] sm:$0xff] %v455_v20 }
 0x1d3   : > { %v755_v21 = vpop.eup %754 }
 0x1d4   : > { %v757_v24 = vpop.eup %756  ;;  %v398_v31 = vpop.xlane.xlu2 %397 }
 0x1d5   : > { %v434_v22 = vpop.f32.mrf.mxu3  ;;  %v759_v28 = vpop.eup %758  ;;  %762 = vrcp.f32 %v398_v31 }
 0x1d6   : > { %v458_v23 = vmul.f32 %v755_v21, %v434_v22  ;;  %v761_v32 = vpop.eup %760  ;;  %764 = vrcp.f32 %v401_v35 }
 0x1d7   : > { %v429_v25 = vpop.f32.mrf.mxu1 }
 0x1d8   : > { %466 = vst [vmem:[%s1133_s10 + $0x18] sm:$0xff] %v458_v23  ;;  %v456_v26 = vmul.f32 %v757_v24, %v429_v25 }
 0x1da   : > { %464 = vst [vmem:[%s1133_s10 + $0x8] sm:$0xff] %v456_v26 }
 0x1db   : > { %v763_v36 = vpop.eup %762 }
 0x1dc   : > { %v765_v39 = vpop.eup %764 }
 0x1dd   : > { %v437_v29 = vpop.f32.mrf.mxu3 }
 0x1de   : > { %v459_v30 = vmul.f32 %v759_v28, %v437_v29 }
 0x1e0   : > { %467 = vst [vmem:[%s1133_s10 + $0x20] sm:$0xff] %v459_v30 }
 0x1e5   : > { %v439_v33 = vpop.f32.mrf.mxu3 }
 0x1e6   : > { %v460_v34 = vmul.f32 %v761_v32, %v439_v33 }
 0x1e8   : > { %468 = vst [vmem:[%s1133_s10 + $0x28] sm:$0xff] %v460_v34 }
 0x1ed   : > { %v442_v37 = vpop.f32.mrf.mxu3 }
 0x1ee   : > { %v461_v38 = vmul.f32 %v763_v36, %v442_v37 }
 0x1f0   : > { %469 = vst [vmem:[%s1133_s10 + $0x30] sm:$0xff] %v461_v38 }
 0x1f5   : > { %v444_v40 = vpop.f32.mrf.mxu3 }
 0x1f6   : > { %v462_v41 = vmul.f32 %v765_v39, %v444_v40 }
 0x1f8   : > { %470 = vst [vmem:[%s1133_s10 + $0x38] sm:$0xff] %v462_v41 }
 0x1f9   : > { %883 = shalt.err (!%p880_p13)
}
 0x1fa   : > { %s947_s28 = smov 128   ;;  %s948_s7 = smov 8  }
 0x1fb   : > { %659 = dma.vmem_to_hbm [thread:$0]  (%p1060_p0), %s487_s4, 1024, %s489_s5, %s472_s11, %s947_s28, %s947_s28, %s948_s7  }
 0x1fc PF: > { %s503_s9 = sand.u32 1, %s922_s12   ;;  %p673_p3 = pnand %p605_p4, %p1064_p2 }
 0x1fd   : > { %s504_s10 = scalar_lea.sflag [#allocation4], %s503_s9 }
 0x1fe   : > { %p674_p5 = pneg %p673_p3 }
 0x200   : > { %917 = dma.done.wait (%p674_p5), %s504_s10, 1024  }
 0x201   : > { %919 = vsyncadd (%p674_p5), %s504_s10, 4294966272  ;;  %s20_s17 = sadd.s32 1, %s942_s17   ;;  %s1192_s12 = smov %s926_s13 }
 0x202   : > { %p17_p1 = scmp.ge.s32.totalorder %s20_s17, 4   ;;  %s1193_s13 = smov %s930_s14 }
 0x203   : > { %s1194_s14 = smov %s1020_s24  ;;  %s1195_s15 = smov %s938_s16 }
 0x204   : > { %s1196_s16 = smov %s1198_s18  ;;  %19 = sbr.rel (!%p17_p1) target bundleno = 7 (0x7), region = 93 }
 0x209   :  { %510 = vsyncpa [#allocation3], 1 }
 0x20a   :  { %512 = vsyncpa [#allocation3 + $0x1], 1 }
 0x20b   :  { %513 = vsyncpa [#allocation6], 1 }
 0x20c   :  { %515 = vsyncpa [#allocation6 + $0x1], 1 }
 0x20d   :  { %516 = vsyncpa [#allocation4], 1 }
 0x20e   :  { %518 = vsyncpa [#allocation4 + $0x1], 1 }

</bundles_post_ra>
